<compile_context>
chip_gen: v6e
topology: v6e:2x2x1
jax: 0.10.0
libtpu: 0.0.40
codegen_flags: <defaults>
</compile_context>

<pallas_src>
import functools

import jax
import jax.numpy as jnp
from jax.experimental import pallas as pl
from jax.experimental.pallas import tpu as pltpu


def _asl_loss_kernel(preds_ref, gts_ref, params_ref, out_ref, acc_ref, *,
                     tile_rows, n_row_tiles, width, n_valid, need_mask):
    t = pl.program_id(1)          # reduction (row-tile) axis, "arbitrary"

    @pl.when(t == 0)
    def _():
        acc_ref[...] = jnp.zeros_like(acc_ref)

    preds = preds_ref[...].astype(jnp.float32)
    gts = gts_ref[...].astype(jnp.float32)

    # params packed as rows: [y_pos, m_pos, y_neg, m_neg], each (1, width).
    y_pos = params_ref[0:1, :]
    m_pos = params_ref[1:2, :]
    y_neg = params_ref[2:3, :]
    m_neg = params_ref[3:4, :]

    # positive branch: shift up, clamp at 1
    p_pos = jnp.minimum(preds + m_pos, 1.0)
    base_pos = 1.0 - p_pos                                   # >= 0
    safe_pos = jnp.where(base_pos > 0.0, base_pos, 1.0)
    pow_pos = jnp.exp(y_pos * jnp.log(safe_pos))             # x^y for x > 0
    pow_pos = jnp.where((base_pos <= 0.0) & (y_pos > 0.0), 0.0, pow_pos)
    term_pos = pow_pos * jnp.log(p_pos)

    # negative branch: shift down, clamp at 0
    p_neg = jnp.maximum(preds - m_neg, 0.0)                  # >= 0
    safe_neg = jnp.where(p_neg > 0.0, p_neg, 1.0)
    pow_neg = jnp.exp(y_neg * jnp.log(safe_neg))
    pow_neg = jnp.where((p_neg <= 0.0) & (y_neg > 0.0), 0.0, pow_neg)
    term_neg = pow_neg * jnp.log(1.0 - p_neg)

    # ce = -gts*term_pos - (1-gts)*term_neg, rearranged (one fewer mul)
    ce = gts * (term_neg - term_pos) - term_neg

    if need_mask:
        p = pl.program_id(0)
        base = (p * n_row_tiles + t) * tile_rows * width
        rows = jax.lax.broadcasted_iota(jnp.int32, ce.shape, 0)
        lanes = jax.lax.broadcasted_iota(jnp.int32, ce.shape, 1)
        elem = base + rows * width + lanes          # flat index into [B*C]
        ce = jnp.where(elem < n_valid, ce, 0.0)

    # per-lane partial sums (VALU add + one sublane reduce per tile)
    acc_ref[...] += jnp.sum(ce, axis=0, keepdims=True)

    # single finalize store per parallel slice (lane-dense (8,128) tile)
    @pl.when(t == n_row_tiles - 1)
    def _():
        total = jnp.sum(acc_ref[...], axis=(0, 1), keepdims=True)
        out_ref[...] = jnp.broadcast_to(total, out_ref.shape)


def _choose_tile_rows(n_rows, width, num_parallel, *, max_rows=1024,
                      max_block_bytes=2 * 1024 * 1024):
    """Row-tile size: multiple of 8, capped so one f32 block stays <= ~2 MiB."""
    rows_cap = max(8, max_block_bytes // (4 * max(1, width)))
    tb = min(max_rows, rows_cap, max(1, -(-n_rows // num_parallel)))
    tb = max(8, -(-tb // 8) * 8)
    return tb


def asl_loss(preds_flat, gts_flat, class_y_pos, class_m_pos,
             class_y_neg, class_m_neg, B, *,
             num_parallel=2, max_rows_per_tile=1024):
    """preds_flat, gts_flat: [B*C]; class_*: [C].  Returns scalar mean loss."""
    C = class_y_pos.shape[0]
    N = B * C
    preds_flat = preds_flat.reshape(-1).astype(jnp.float32)
    gts_flat = gts_flat.reshape(-1).astype(jnp.float32)

    params_c = [p.reshape(-1).astype(jnp.float32)
                for p in (class_y_pos, class_m_pos, class_y_neg, class_m_neg)]

    if 128 % C == 0:
        # Lane-dense fast path: fold the flat [B*C] stream into 128-lane rows.
        # Because 128 % C == 0, every row sees the same period-C class pattern,
        # so one resident (4, 128) params block covers all rows.
        W = 128
        params = jnp.stack([jnp.tile(p, W // C) for p in params_c])
    else:
        # General fallback: keep the class axis on lanes (width = C).
        W = C
        params = jnp.stack(params_c)

    R = -(-N // W)                               # rows of valid data
    P = max(1, int(num_parallel))
    TB = _choose_tile_rows(R, W, P, max_rows=max_rows_per_tile)
    NT = -(-R // (P * TB))
    R_pad = P * NT * TB
    total_elems = R_pad * W
    need_mask = total_elems != N

    # 0.5 / 0.0 padding keeps every term finite; padded elements are masked
    # in-kernel anyway.
    preds2d = jnp.pad(preds_flat, (0, total_elems - N),
                      constant_values=0.5).reshape(R_pad, W)
    gts2d = jnp.pad(gts_flat, (0, total_elems - N),
                    constant_values=0.0).reshape(R_pad, W)

    kernel = functools.partial(_asl_loss_kernel,
                               tile_rows=TB, n_row_tiles=NT, width=W,
                               n_valid=N, need_mask=need_mask)

    out = pl.pallas_call(
        kernel,
        out_shape=jax.ShapeDtypeStruct((8 * P, 128), jnp.float32),
        grid_spec=pltpu.PrefetchScalarGridSpec(
            num_scalar_prefetch=0,
            grid=(P, NT),
            in_specs=[
                pl.BlockSpec((TB, W), lambda p, t: (p * NT + t, 0)),  # preds
                pl.BlockSpec((TB, W), lambda p, t: (p * NT + t, 0)),  # gts
                pl.BlockSpec((4, W), lambda p, t: (0, 0)),            # params (resident)
            ],
            out_specs=pl.BlockSpec((8, 128), lambda p, t: (p, 0)),
            scratch_shapes=[pltpu.VMEM((1, W), jnp.float32)],
        ),
        compiler_params=pltpu.CompilerParams(
            dimension_semantics=("parallel", "arbitrary"),
            vmem_limit_bytes=32 * 1024 * 1024),
        cost_estimate=pl.CostEstimate(
            flops=20 * total_elems,
            transcendentals=6 * total_elems,
            bytes_accessed=2 * total_elems * 4 + 4 * W * 4 + 8 * P * 128 * 4),
    )(preds2d, gts2d, params)

    # one partial sum per parallel slice (already masked); combine + mean here.
    partials = out[0::8, 0]
    return jnp.sum(partials) / N


def asl_loss_ref(preds_flat, gts_flat, class_y_pos, class_m_pos,
                 class_y_neg, class_m_neg, B):
    """Pure-JAX reference mirroring the PyTorch/numpy forward."""
    C = class_y_pos.shape[0]
    preds = preds_flat.reshape(B, C).astype(jnp.float32)
    gts = gts_flat.reshape(B, C).astype(jnp.float32)
    y_pos = class_y_pos[None, :].astype(jnp.float32)
    m_pos = class_m_pos[None, :].astype(jnp.float32)
    y_neg = class_y_neg[None, :].astype(jnp.float32)
    m_neg = class_m_neg[None, :].astype(jnp.float32)
    p_pos = jnp.minimum(preds + m_pos, 1.0)
    term_pos = jnp.power(1.0 - p_pos, y_pos) * jnp.log(p_pos)
    p_neg = jnp.maximum(preds - m_neg, 0.0)
    term_neg = jnp.power(p_neg, y_neg) * jnp.log(1.0 - p_neg)
    return jnp.mean(-gts * term_pos - (1.0 - gts) * term_neg)


if __name__ == "__main__":
    # Deterministic "config" parameters (stand-in for the json files;
    # TODO(synk): original loads per-class ASL weights from config json paths).
    C = 4  # number of disease classes
    class_y_pos = jnp.array([1.0, 0.5, 2.0, 1.0], dtype=jnp.float32)      # gamma+
    class_m_pos = jnp.array([0.00, 0.01, 0.00, 0.02], dtype=jnp.float32)  # margin+
    class_y_neg = jnp.array([4.0, 3.0, 2.0, 1.0], dtype=jnp.float32)      # gamma-
    class_m_neg = jnp.array([0.02, 0.05, 0.10, 0.03], dtype=jnp.float32)  # margin-

    key = jax.random.PRNGKey(0)
    k1, k2, k3, k4, k5, k6, k7 = jax.random.split(key, 7)

    # --- Test 1: module-sized shapes (B=2, C=4); exercises padding + masking
    #     on the lane-dense fast path.
    B = 2
    preds = jax.random.uniform(k1, (B * C,), minval=0.15, maxval=0.9,
                               dtype=jnp.float32)
    gts = jax.random.bernoulli(k2, 0.5, (B * C,)).astype(jnp.float32)

    loss = asl_loss(preds, gts, class_y_pos, class_m_pos,
                    class_y_neg, class_m_neg, B)
    jax.block_until_ready(loss)
    loss_ref = asl_loss_ref(preds, gts, class_y_pos, class_m_pos,
                            class_y_neg, class_m_neg, B)
    assert jnp.allclose(loss, loss_ref, rtol=1e-4, atol=1e-5), (loss, loss_ref)

    # --- Test 2: multi-tile reduction path (small row tiles -> NT > 1),
    #     exercises accumulate / finalize / parallel-partial combine logic.
    B2 = 600
    preds2 = jax.random.uniform(k3, (B2 * C,), minval=0.05, maxval=0.95,
                                dtype=jnp.float32)
    gts2 = jax.random.bernoulli(k4, 0.5, (B2 * C,)).astype(jnp.float32)

    loss2 = asl_loss(preds2, gts2, class_y_pos, class_m_pos,
                     class_y_neg, class_m_neg, B2, max_rows_per_tile=8)
    jax.block_until_ready(loss2)
    loss2_ref = asl_loss_ref(preds2, gts2, class_y_pos, class_m_pos,
                             class_y_neg, class_m_neg, B2)
    assert jnp.allclose(loss2, loss2_ref, rtol=1e-4, atol=1e-5), (loss2, loss2_ref)

    # --- Test 3: class count that does not divide 128 -> general (width=C)
    #     fallback path.
    C3 = 6
    B3 = 10
    y_pos3 = jnp.array([1.0, 0.5, 2.0, 1.0, 3.0, 0.0], dtype=jnp.float32)
    m_pos3 = jnp.array([0.00, 0.01, 0.00, 0.02, 0.03, 0.00], dtype=jnp.float32)
    y_neg3 = jnp.array([4.0, 3.0, 2.0, 1.0, 2.0, 5.0], dtype=jnp.float32)
    m_neg3 = jnp.array([0.02, 0.05, 0.10, 0.03, 0.00, 0.04], dtype=jnp.float32)
    preds3 = jax.random.uniform(k5, (B3 * C3,), minval=0.05, maxval=0.95,
                                dtype=jnp.float32)
    gts3 = jax.random.bernoulli(k6, 0.5, (B3 * C3,)).astype(jnp.float32)

    loss3 = asl_loss(preds3, gts3, y_pos3, m_pos3, y_neg3, m_neg3, B3)
    jax.block_until_ready(loss3)
    loss3_ref = asl_loss_ref(preds3, gts3, y_pos3, m_pos3, y_neg3, m_neg3, B3)
    assert jnp.allclose(loss3, loss3_ref, rtol=1e-4, atol=1e-5), (loss3, loss3_ref)

    print("KERNEL_OK")
</pallas_src>

<mosaic_0001>
module attributes {stable_mosaic.version = 11 : i64} {
  func.func @_asl_loss_kernel(%arg0: i32, %arg1: i32, %arg2: memref<8x128xf32, #tpu.memory_space<vmem>>, %arg3: memref<8x128xf32, #tpu.memory_space<vmem>>, %arg4: memref<4x128xf32, #tpu.memory_space<vmem>>, %arg5: memref<8x128xf32, #tpu.memory_space<vmem>>, %arg6: memref<1x128xf32, #tpu.memory_space<vmem>>) attributes {dimension_semantics = [#tpu.dimension_semantics<parallel>, #tpu.dimension_semantics<arbitrary>], iteration_bounds = array<i64: 2, 1>, scalar_prefetch = 0 : i64, scratch_operands = 1 : i64, tpu.core_type = #tpu.core_type<tc>, window_params = [{transform_indices = @transform_0, window_bounds = array<i64: 8, 128>}, {transform_indices = @transform_1, window_bounds = array<i64: 8, 128>}, {pipeline_mode = #tpu.pipeline_mode<synchronous>, transform_indices = @transform_2, window_bounds = array<i64: 4, 128>}, {transform_indices = @transform_3, window_bounds = array<i64: 8, 128>}]} {
    %c0_i32 = arith.constant 0 : i32
    %0 = arith.cmpi eq, %arg1, %c0_i32 : i32
    %1 = arith.extui %0 : i1 to i32
    %c0_i32_0 = arith.constant 0 : i32
    %2 = arith.cmpi ne, %1, %c0_i32_0 : i32
    scf.if %2 {
      %cst_32 = arith.constant 0.000000e+00 : f32
      %83 = vector.broadcast %cst_32 : f32 to vector<1x128xf32>
      %c0_33 = arith.constant 0 : index
      %c0_34 = arith.constant 0 : index
      %84 = vector.load %arg6[%c0_33, %c0_34] : memref<1x128xf32, #tpu.memory_space<vmem>>, vector<1x128xf32>
      tpu.vector_store %arg6[%c0_33, %c0_34], %83 {strides = array<i32>} : memref<1x128xf32, #tpu.memory_space<vmem>>, vector<1x128xf32>,
    } else {
    }
    %c0 = arith.constant 0 : index
    %c0_1 = arith.constant 0 : index
    %3 = vector.load %arg2[%c0, %c0_1] : memref<8x128xf32, #tpu.memory_space<vmem>>, vector<8x128xf32>
    %c0_2 = arith.constant 0 : index
    %c0_3 = arith.constant 0 : index
    %4 = vector.load %arg3[%c0_2, %c0_3] : memref<8x128xf32, #tpu.memory_space<vmem>>, vector<8x128xf32>
    %c0_4 = arith.constant 0 : index
    %c0_5 = arith.constant 0 : index
    %5 = vector.load %arg4[%c0_4, %c0_5] : memref<4x128xf32, #tpu.memory_space<vmem>>, vector<1x128xf32>
    %c1 = arith.constant 1 : index
    %c0_6 = arith.constant 0 : index
    %6 = vector.load %arg4[%c1, %c0_6] : memref<4x128xf32, #tpu.memory_space<vmem>>, vector<1x128xf32>
    %c2 = arith.constant 2 : index
    %c0_7 = arith.constant 0 : index
    %7 = vector.load %arg4[%c2, %c0_7] : memref<4x128xf32, #tpu.memory_space<vmem>>, vector<1x128xf32>
    %c3 = arith.constant 3 : index
    %c0_8 = arith.constant 0 : index
    %8 = vector.load %arg4[%c3, %c0_8] : memref<4x128xf32, #tpu.memory_space<vmem>>, vector<1x128xf32>
    %9 = vector.broadcast %6 : vector<1x128xf32> to vector<8x128xf32>
    %10 = arith.addf %3, %9 : vector<8x128xf32>
    %cst = arith.constant 1.000000e+00 : f32
    %11 = vector.broadcast %cst : f32 to vector<8x128xf32>
    %12 = arith.minimumf %10, %11 : vector<8x128xf32>
    %cst_9 = arith.constant 1.000000e+00 : f32
    %13 = vector.broadcast %cst_9 : f32 to vector<8x128xf32>
    %14 = arith.subf %13, %12 : vector<8x128xf32>
    %cst_10 = arith.constant 0.000000e+00 : f32
    %15 = vector.broadcast %cst_10 : f32 to vector<8x128xf32>
    %16 = arith.cmpf ogt, %14, %15 : vector<8x128xf32>
    %cst_11 = arith.constant 1.000000e+00 : f32
    %17 = vector.broadcast %cst_11 : f32 to vector<8x128xf32>
    %18 = arith.select %16, %14, %17 : vector<8x128xi1>, vector<8x128xf32>
    %19 = math.log %18 : vector<8x128xf32>
    %20 = vector.broadcast %5 : vector<1x128xf32> to vector<8x128xf32>
    %21 = arith.mulf %20, %19 : vector<8x128xf32>
    %22 = math.exp %21 : vector<8x128xf32>
    %cst_12 = arith.constant 0.000000e+00 : f32
    %23 = vector.broadcast %cst_12 : f32 to vector<8x128xf32>
    %24 = arith.cmpf ole, %14, %23 : vector<8x128xf32>
    %cst_13 = arith.constant 0.000000e+00 : f32
    %25 = vector.broadcast %cst_13 : f32 to vector<1x128xf32>
    %26 = arith.cmpf ogt, %5, %25 : vector<1x128xf32>
    %27 = vector.broadcast %26 : vector<1x128xi1> to vector<8x128xi1>
    %28 = arith.andi %24, %27 : vector<8x128xi1>
    %cst_14 = arith.constant 0.000000e+00 : f32
    %29 = vector.broadcast %cst_14 : f32 to vector<8x128xf32>
    %30 = arith.select %28, %29, %22 : vector<8x128xi1>, vector<8x128xf32>
    %31 = math.log %12 : vector<8x128xf32>
    %32 = arith.mulf %30, %31 : vector<8x128xf32>
    %33 = vector.broadcast %8 : vector<1x128xf32> to vector<8x128xf32>
    %34 = arith.subf %3, %33 : vector<8x128xf32>
    %cst_15 = arith.constant 0.000000e+00 : f32
    %35 = vector.broadcast %cst_15 : f32 to vector<8x128xf32>
    %36 = arith.maximumf %34, %35 : vector<8x128xf32>
    %cst_16 = arith.constant 0.000000e+00 : f32
    %37 = vector.broadcast %cst_16 : f32 to vector<8x128xf32>
    %38 = arith.cmpf ogt, %36, %37 : vector<8x128xf32>
    %cst_17 = arith.constant 1.000000e+00 : f32
    %39 = vector.broadcast %cst_17 : f32 to vector<8x128xf32>
    %40 = arith.select %38, %36, %39 : vector<8x128xi1>, vector<8x128xf32>
    %41 = math.log %40 : vector<8x128xf32>
    %42 = vector.broadcast %7 : vector<1x128xf32> to vector<8x128xf32>
    %43 = arith.mulf %42, %41 : vector<8x128xf32>
    %44 = math.exp %43 : vector<8x128xf32>
    %cst_18 = arith.constant 0.000000e+00 : f32
    %45 = vector.broadcast %cst_18 : f32 to vector<8x128xf32>
    %46 = arith.cmpf ole, %36, %45 : vector<8x128xf32>
    %cst_19 = arith.constant 0.000000e+00 : f32
    %47 = vector.broadcast %cst_19 : f32 to vector<1x128xf32>
    %48 = arith.cmpf ogt, %7, %47 : vector<1x128xf32>
    %49 = vector.broadcast %48 : vector<1x128xi1> to vector<8x128xi1>
    %50 = arith.andi %46, %49 : vector<8x128xi1>
    %cst_20 = arith.constant 0.000000e+00 : f32
    %51 = vector.broadcast %cst_20 : f32 to vector<8x128xf32>
    %52 = arith.select %50, %51, %44 : vector<8x128xi1>, vector<8x128xf32>
    %cst_21 = arith.constant 1.000000e+00 : f32
    %53 = vector.broadcast %cst_21 : f32 to vector<8x128xf32>
    %54 = arith.subf %53, %36 : vector<8x128xf32>
    %55 = math.log %54 : vector<8x128xf32>
    %56 = arith.mulf %52, %55 : vector<8x128xf32>
    %57 = arith.subf %56, %32 : vector<8x128xf32>
    %58 = arith.mulf %4, %57 : vector<8x128xf32>
    %59 = arith.subf %58, %56 : vector<8x128xf32>
    %c1_i32 = arith.constant 1 : i32
    %60 = arith.muli %arg0, %c1_i32 : i32
    %61 = arith.addi %60, %arg1 : i32
    %c8_i32 = arith.constant 8 : i32
    %62 = arith.muli %61, %c8_i32 : i32
    %c128_i32 = arith.constant 128 : i32
    %63 = arith.muli %62, %c128_i32 : i32
    %64 = tpu.iota {dimensions = array<i32: 0>} : vector<8x128xi32>
    %65 = tpu.iota {dimensions = array<i32: 1>} : vector<8x128xi32>
    %c128_i32_22 = arith.constant 128 : i32
    %66 = vector.broadcast %c128_i32_22 : i32 to vector<8x128xi32>
    %67 = arith.muli %64, %66 : vector<8x128xi32>
    %68 = vector.broadcast %63 : i32 to vector<8x128xi32>
    %69 = arith.addi %68, %67 : vector<8x128xi32>
    %70 = arith.addi %69, %65 : vector<8x128xi32>
    %c8_i32_23 = arith.constant 8 : i32
    %71 = vector.broadcast %c8_i32_23 : i32 to vector<8x128xi32>
    %72 = arith.cmpi slt, %70, %71 : vector<8x128xi32>
    %cst_24 = arith.constant 0.000000e+00 : f32
    %73 = vector.broadcast %cst_24 : f32 to vector<8x128xf32>
    %74 = arith.select %72, %59, %73 : vector<8x128xi1>, vector<8x128xf32>
    %c0_25 = arith.constant 0 : index
    %c0_26 = arith.constant 0 : index
    %75 = vector.load %arg6[%c0_25, %c0_26] : memref<1x128xf32, #tpu.memory_space<vmem>>, vector<1x128xf32>
    %cst_27 = arith.constant dense<0.000000e+00> : vector<128xf32>
    %76 = vector.multi_reduction <add>, %74, %cst_27 [0] : vector<8x128xf32> to vector<128xf32>
    %77 = vector.shape_cast %76 : vector<128xf32> to vector<1x128xf32>
    %78 = arith.addf %75, %77 : vector<1x128xf32>
    %c0_28 = arith.constant 0 : index
    %c0_29 = arith.constant 0 : index
    %79 = vector.load %arg6[%c0_28, %c0_29] : memref<1x128xf32, #tpu.memory_space<vmem>>, vector<1x128xf32>
    tpu.vector_store %arg6[%c0_28, %c0_29], %78 {strides = array<i32>} : memref<1x128xf32, #tpu.memory_space<vmem>>, vector<1x128xf32>,
    %c0_i32_30 = arith.constant 0 : i32
    %80 = arith.cmpi eq, %arg1, %c0_i32_30 : i32
    %81 = arith.extui %80 : i1 to i32
    %c0_i32_31 = arith.constant 0 : i32
    %82 = arith.cmpi ne, %81, %c0_i32_31 : i32
    scf.if %82 {
      %c0_32 = arith.constant 0 : index
      %c0_33 = arith.constant 0 : index
      %83 = vector.load %arg6[%c0_32, %c0_33] : memref<1x128xf32, #tpu.memory_space<vmem>>, vector<1x128xf32>
      %84 = vector.shape_cast %83 : vector<1x128xf32> to vector<1x1x128xf32>
      %cst_34 = arith.constant dense<0.000000e+00> : vector<1xf32>
      %85 = vector.multi_reduction <add>, %84, %cst_34 [1, 2] : vector<1x1x128xf32> to vector<1xf32>
      %86 = vector.shape_cast %85 : vector<1xf32> to vector<1x1x1xf32>
      %87 = vector.extract %86[0, 0, 0] : f32 from vector<1x1x1xf32>
      %88 = vector.broadcast %87 : f32 to vector<1x1xf32>
      %89 = vector.shape_cast %88 : vector<1x1xf32> to vector<1x1xf32>
      %90 = vector.broadcast %89 : vector<1x1xf32> to vector<8x128xf32>
      %c0_35 = arith.constant 0 : index
      %c0_36 = arith.constant 0 : index
      %91 = vector.load %arg5[%c0_35, %c0_36] : memref<8x128xf32, #tpu.memory_space<vmem>>, vector<8x128xf32>
      tpu.vector_store %arg5[%c0_35, %c0_36], %90 {strides = array<i32>} : memref<8x128xf32, #tpu.memory_space<vmem>>, vector<8x128xf32>,
    } else {
    }
    return
  }
  func.func @transform_0(%arg0: i32, %arg1: i32) -> (i32, i32) {
    %c1_i32 = arith.constant 1 : i32
    %0 = arith.muli %arg0, %c1_i32 : i32
    %1 = arith.addi %0, %arg1 : i32
    %c0_i32 = arith.constant 0 : i32
    %c0_i32_0 = arith.constant 0 : i32
    return %1, %c0_i32 : i32, i32
  }
  func.func @transform_1(%arg0: i32, %arg1: i32) -> (i32, i32) {
    %c1_i32 = arith.constant 1 : i32
    %0 = arith.muli %arg0, %c1_i32 : i32
    %1 = arith.addi %0, %arg1 : i32
    %c0_i32 = arith.constant 0 : i32
    %c0_i32_0 = arith.constant 0 : i32
    return %1, %c0_i32 : i32, i32
  }
  func.func @transform_2(%arg0: i32, %arg1: i32) -> (i32, i32) {
    %c0_i32 = arith.constant 0 : i32
    %c0_i32_0 = arith.constant 0 : i32
    %c0_i32_1 = arith.constant 0 : i32
    return %c0_i32, %c0_i32_0 : i32, i32
  }
  func.func @transform_3(%arg0: i32, %arg1: i32) -> (i32, i32) {
    %c0_i32 = arith.constant 0 : i32
    %c0_i32_0 = arith.constant 0 : i32
    return %arg0, %c0_i32 : i32, i32
  }
}

</mosaic_0001>

<bundles_post_ra>
// kernel: tpu_custom_call.1
= control target key start
LH: loop header
LB: loop body
LE: loop exit
PB: predicated region body
PF: predicated region fallthrough
CT: control target
= control target key end

     0   :  { %s999_s0 = inlined_call_operand.hbm [shape: f32[16,128], index: 0, kind: input, shape index: {}]   ;;  %s1000_s1 = inlined_call_operand.hbm [shape: f32[16,128], index: 1, kind: input, shape index: {}]   ;;  %s1001_s2 = inlined_call_operand.hbm [shape: f32[4,128], index: 2, kind: input, shape index: {}]   ;;  %s1002_s3 = inlined_call_operand.hbm [shape: f32[16,128], index: 3, kind: output, shape index: {}]  }
   0x1   :  { %1003 = sst [smem:[#allocation14_spill]] %s999_s0 }
   0x2   :  { %8 = vsyncpa [#allocation4], 0 }
   0x3   :  { %10 = vsyncpa [#allocation4 + $0x1], 0 }
   0x4   :  { %11 = vsyncpa [#allocation7], 0 }
   0x5   :  { %13 = vsyncpa [#allocation7 + $0x1], 0 }
   0x6   :  { %14 = vsyncpa [#allocation5], 0 }
   0x7   :  { %16 = vsyncpa [#allocation5 + $0x1], 0  ;;  %s808_s12 = smov 0   ;;  %s810_s13 = smov 0  }
   0x8   :  { %s812_s14 = smov 0   ;;  %s814_s15 = smov 0  }
   0x9   :  { %s816_s16 = smov 0   ;;  %s818_s17 = smov 0  }
   0xa LB: > { %s839_s18 = sadd.s32 4294967295, %s780_s17   ;;  %s496_s19 = sadd.s32 4294967294, %s780_s17   ;;  %s780_s17 = sphi %s818_s17, %s22_s17   ;;  %s776_s16 = sphi %s816_s16, %s1018_s16   ;;  %s772_s15 = sphi %s814_s15, %s1017_s15   ;;  %s768_s14 = sphi %s812_s14, %s1016_s14   ;;  %s764_s13 = sphi %s810_s13, %s1015_s13   ;;  %s760_s12 = sphi %s808_s12, %s1014_s12  }
   0xb   : > { %p56_p0 = scmp.ne.s32.totalorder %s764_s13, %s760_s12  ;;  %p57_p1 = scmp.eq.s32.totalorder %s839_s18, 0 }
   0xc   : > { %p135_p3 = scmp.eq.s32.totalorder %s496_s19, 1  ;;  %p497_p5 = scmp.ge.s32.totalorder %s780_s17, 1 }
   0xd   : > { %p848_p4 = por %p57_p1, %p56_p0  ;;  %p142_p7 = scmp.lt.s32.totalorder %s780_s17, 3 }
   0xe   : > { %p853_p6 = por %p135_p3, %p56_p0  ;;  %s782_s23 = smov [#allocation8]  }
   0xf   : > { %p858_p8 = pnand %p497_p5, %p142_p7  ;;  %s155_s24 = sshll.u32 %s782_s23, 4  ;;  %s156_s24 = int_to_ptr.vmem [resolvable:$true] %s155_s24 }
  0x10   : > { %s1005_s21 = scalar_select %p853_p6, 1, 0 }
  0x11   : > { %p528_p10 = pneg %p858_p8  ;;  %s34_s26 = sadd.s32 1, %s776_s16 }
  0x12   : > { %s43_s27 = sadd.s32 1, %s768_s14  ;;  %p36_p12 = scmp.ge.s32.totalorder %s34_s26, 2 }
  0x13   : > { %p867_p11 = pnand %p528_p10, %p57_p1  ;;  %s621_s28 = scalar_lea.vmem %s156_s24, 64 }
  0x14   : > { %p622_p0 = scmp.ne.s32.totalorder %s156_s24, %s621_s28  ;;  %p629_p7 = scmp.lt.s32.totalorder %s156_s24, %s156_s24 }
  0x15   : > { %p612_p13 = pneg %p867_p11  ;;  %p630_p2 = scmp.lt.s32.totalorder %s621_s28, %s621_s28 }
  0x17   : > { %p624_p3 = pnand %p622_p0, %p612_p13  ;;  %p631_p9 = por %p630_p2, %p629_p7 }
  0x19   : > { %p625_p5 = pneg %p624_p3 }
  0x1b   : > { %p632_p6 = pnand %p631_p9, %p625_p5 }
  0x1d   : > { %635 = shalt.err (!%p632_p6)
}
  0x1e   : > { %531 = dma.hbm_to_vmem [thread:$0]  (!%p867_p11), %s1001_s2, 64, %s156_s24, [#allocation7]  }
  0x1f   : > { %s1020_s26 = smov (%p36_p12, %s34_s26), 0  ;;  %p50_p2 = scmp.ne.s32.totalorder %s768_s14, %s764_s13 }
  0x20   : > { %p51_p6 = scmp.eq.s32.totalorder %s780_s17, 0  ;;  %s40_s4 = ssub.s32 %s776_s16, %s1020_s26 }
  0x21   : > { %p544_p9 = scmp.lt.s32.totalorder %s780_s17, 2  ;;  %p41_p10 = scmp.eq.s32.totalorder %s40_s4, 0 }
  0x22   : > { %p52_p13 = por %p51_p6, %p50_p2  ;;  %p1008_p0 = scmp.eq.s32.totalorder %s839_s18, 1 }
  0x23   : > { %s166_s6 = sand.u32 1, %s768_s14   ;;  %s501_s9 = sshll.u32 %s776_s16, 7 }
  0x24   : > { %p890_p3 = por %p1008_p0, %p50_p2  ;;  %s500_s8 = sshll.u32 %s166_s6, 3 }
  0x25   : > { %s896_s7 = scalar_select %p41_p10, %s768_s14, %s43_s27  }
  0x26   : > { %s1010_s0 = sld [smem:[#allocation14_spill]]  ;;  %s170_s23 = scalar_lea.vmem [#allocation3], %s500_s8 }
  0x27   : > { %s178_s24 = sshll.u32 %s170_s23, 4  ;;  %p902_p11 = pnand %p544_p9, %p52_p13  ;;  %s179_s24 = int_to_ptr.vmem [resolvable:$true] %s178_s24 }
  0x28   : > { %s909_s27 = scalar_lea.hbm %s1000_s1, %s501_s9  ;;  %s185_s30 = sand.u32 1, %s780_s17  }
  0x29   : > { %s167_s4 = scalar_lea.sflag [#allocation4], %s166_s6  ;;  %p638_p12 = pneg %p902_p11 }
  0x2a   : > { %s649_s10 = scalar_lea.vmem %s179_s24, 128  ;;  %s783_s11 = smov [#allocation3]  }
  0x2b   : > { %p650_p5 = scmp.ne.s32.totalorder %s179_s24, %s649_s10  ;;  %s654_s23 = sshll.u32 %s783_s11, 4  ;;  %s655_s23 = int_to_ptr.vmem [resolvable:$false] %s654_s23 }
  0x2c   : > { %s176_s19 = scalar_lea.hbm %s1010_s0, %s501_s9  ;;  %s656_s0 = scalar_lea.vmem %s655_s23, 256 }
  0x2d   : > { %p652_p7 = pnand %p650_p5, %p638_p12  ;;  %p657_p6 = scmp.lt.s32.totalorder %s179_s24, %s655_s23 }
  0x2e   : > { %p658_p9 = scmp.lt.s32.totalorder %s656_s0, %s649_s10 }
  0x2f   : > { %p653_p2 = pneg %p652_p7 }
  0x30   : > { %p659_p10 = por %p658_p9, %p657_p6 }
  0x32   : > { %p660_p13 = pnand %p659_p10, %p653_p2 }
  0x34   : > { %663 = shalt.err (!%p660_p13)
}
  0x35   : > { %535 = dma.hbm_to_vmem [thread:$0]  (!%p902_p11), %s176_s19, 128, %s179_s24, %s167_s4  }
  0x36   : > { %s189_s6 = scalar_lea.vmem [#allocation6], %s500_s8  ;;  %s186_s28 = scalar_lea.sflag [#allocation7], %s185_s30 }
  0x37   : > { %s197_s9 = sshll.u32 %s189_s6, 4  ;;  %s784_s11 = smov [#allocation6]   ;;  %s198_s9 = int_to_ptr.vmem [resolvable:$true] %s197_s9 }
  0x38   : > { %s677_s29 = scalar_lea.vmem %s198_s9, 128  ;;  %s682_s23 = sshll.u32 %s784_s11, 4  ;;  %s683_s23 = int_to_ptr.vmem [resolvable:$false] %s682_s23 }
  0x39   : > { %p678_p0 = scmp.ne.s32.totalorder %s198_s9, %s677_s29  ;;  %s684_s0 = scalar_lea.vmem %s683_s23, 256 }
  0x3a   : > { %p685_p2 = scmp.lt.s32.totalorder %s198_s9, %s683_s23  ;;  %p686_p6 = scmp.lt.s32.totalorder %s684_s0, %s677_s29 }
  0x3b   : > { %p680_p5 = pnand %p678_p0, %p638_p12 }
  0x3c   : > { %p687_p9 = por %p686_p6, %p685_p2 }
  0x3d   : > { %p681_p7 = pneg %p680_p5 }
  0x3f   : > { %p688_p10 = pnand %p687_p9, %p681_p7 }
  0x41   : > { %691 = shalt.err (!%p688_p10)
}
  0x42   : > { %538 = dma.hbm_to_vmem [thread:$0]  (!%p902_p11), %s909_s27, 128, %s198_s9, %s186_s28  }
  0x43   : > { %206 = sbr.rel (%p858_p8) target bundleno = 369 (0x171), region = 32  ;;  %s928_s8 = sand.u32 (!%p858_p8), 1, %s764_s13  }
  0x44   : > { %s931_s19 = sshll.u32 (!%p858_p8), %s928_s8, 3  ;;  %s209_s24 = scalar_lea.sflag (!%p858_p8), [#allocation4], %s928_s8 }
  0x45   : > { %s212_s30 = scalar_lea.vmem (!%p858_p8), [#allocation3], %s931_s19 }
  0x48   : > { %743 = dma.done.wait (%p848_p4), %s209_s24, 128  }
  0x49   : > { %745 = vsyncadd (%p848_p4), %s209_s24, 4294967168  ;;  %s217_s22 = sand.u32 1, %s839_s18   ;;  %s221_s27 = scalar_lea.vmem [#allocation6], %s931_s19 }
  0x4a   : > { %s218_s25 = scalar_lea.sflag [#allocation7], %s217_s22 }
  0x4b   : > { %747 = dma.done.wait (%p848_p4), %s218_s25, 128  }
  0x4c   : > { %749 = vsyncadd (%p848_p4), %s218_s25, 4294967168 }
  0x4d   : > { %751 = dma.done.wait (%p57_p1), [#allocation7], 64  }
  0x4e   : > { %753 = vsyncadd (%p57_p1), [#allocation7], 4294967232  ;;  %v785_v0 = vmov 0.0   ;;  %v260_v1 = vld [vmem:[%s212_s30] sm:$0xff]  ;;  %v277_v10 = vlaneseq  ;;  %v786_v27 = vmov 0   ;;  %s511_s18 = sshll.u32 %s772_s15, 10 }
  0x4f   : > { %259 = vst [vmem:[#allocation2] sm:$0x1] %v785_v0  ;;  %v509_v2 = vld [vmem:[#allocation8 + $0x1] ss:$0 sm:$0xff]  ;;  %v510_v3 = vld [vmem:[#allocation8 + $0x3] ss:$0 sm:$0xff]  ;;  %v338_v36 = vstv %s511_s18 }
  0x50   : > { %v270_v4 = vadd.f32 %v509_v2, %v260_v1  ;;  %v301_v5 = vsub.f32 %v260_v1, %v510_v3  ;;  %v278_v12 = vshrl.u32 %v277_v10, 7  ;;  %v264_v14 = vld [vmem:[#allocation8 + $0x2] sm:$0x1]  ;;  %v262_v15 = vld [vmem:[#allocation8] sm:$0x1]  ;;  %v336_v40 = vand.u32 127, %v277_v10 }
  0x51   : > { %vm315_vm2 = vcmp.gt.f32.partialorder %v264_v14, 0.0  ;;  %vm285_vm3 = vcmp.gt.f32.partialorder %v262_v15, 0.0  ;;  %v261_v46 = vld [vmem:[%s221_s27] sm:$0xff]  ;;  %vm356_vm11 = vcmask 1040384   ;;  %s252_s20 = scalar_lea.vmem [#allocation9], %s931_s19  ;;  %s513_s10 = sshll.u32 %s772_s15, 7 }
  0x52   : > { %v271_v6 = vmin.f32 %v270_v4, 1.0  ;;  %v302_v7 = vmax.f32 %v301_v5, 0.0  ;;  %v279_v13 = vsub.s32 0, %v278_v12  ;;  %v316_v28 = vsel %vm315_vm2, 1, %v786_v27  ;;  %s383_s4 = sshll.u32 %s252_s20, 4  ;;  %s381_s29 = scalar_lea.hbm %s1002_s3, %s513_s10  ;;  %s954_s4 = int_to_ptr.vmem [resolvable:$true] %s383_s4 }
  0x53   : > { %v286_v29 = vsel %vm285_vm3, 1, %v786_v27  ;;  %v337_v34 = vmul.u32 128, %v278_v12  ;;  %s370_s11 = scalar_lea.sflag [#allocation5], %s928_s8  ;;  %s692_s23 = scalar_lea.vmem %s954_s4, 128 }
  0x54   : > { %v272_v8 = vsub.f32 1.0, %v271_v6  ;;  %vm303_vm0 = vcmp.gt.f32.partialorder %v302_v7, 0.0  ;;  %v324_v16 = vsub.f32 1.0, %v302_v7  ;;  %v310_v17 = vrot.slane %v264_v14, %v279_v13  ;;  %p693_p1 = scmp.ne.s32.totalorder %s954_s4, %s692_s23  ;;  %s787_s0 = smov [#allocation9]  }
  0x55   : > { %v304_v9 = vsel %vm303_vm0, %v302_v7, 1.0  ;;  %v280_v19 = vrot.slane %v262_v15, %v279_v13  ;;  %v320_v30 = vrot.slane %v316_v28, %v279_v13  ;;  %v290_v31 = vrot.slane %v286_v29, %v279_v13  ;;  %s696_s15 = sshll.u32 %s787_s0, 4  ;;  %s697_s15 = int_to_ptr.vmem [resolvable:$false] %s696_s15 }
  0x56   : > { %vm273_vm1 = vcmp.gt.f32.partialorder %v272_v8, 0.0  ;;  %598 = vlog2.f32 %v304_v9  ;;  %vm314_vm4 = vcmp.le.f32.partialorder %v302_v7, 0.0  ;;  %vm284_vm6 = vcmp.le.f32.partialorder %v272_v8, 0.0  ;;  %v343_v57 = vld [vmem:[#allocation2] sm:$0x1]  ;;  %p694_p4 = pnand %p693_p1, %p890_p3  ;;  %s698_s19 = scalar_lea.vmem %s697_s15, 256 }
  0x57   : > { %v274_v11 = vsel %vm273_vm1, %v272_v8, 1.0  ;;  %vm321_vm5 = vcmp.eq.s32.totalorder %v320_v30, 1  ;;  %vm291_vm7 = vcmp.eq.s32.totalorder %v290_v31, 1  ;;  %v339_v41 = vadd.s32 %v338_v36, %v337_v34  ;;  %p699_p11 = scmp.lt.s32.totalorder %s954_s4, %s697_s15  ;;  %p700_p12 = scmp.lt.s32.totalorder %s698_s19, %s692_s23 }
  0x58   : > { %600 = vlog2.f32 %v274_v11  ;;  %vm322_vm8 = vmand %vm314_vm4, %vm321_vm5  ;;  %p695_p8 = pneg %p694_p4 }
  0x59   : > { %602 = vlog2.f32 %v324_v16  ;;  %vm292_vm9 = vmand %vm284_vm6, %vm291_vm7  ;;  %v340_v47 = vadd.s32 %v339_v41, %v336_v40  ;;  %p701_p13 = por %p700_p12, %p699_p11 }
  0x5a   : > { %604 = vlog2.f32 %v271_v6 }
  0x5b   : > { %vm341_vm10 = vcmp.lt.s32.totalorder %v340_v47, 8  ;;  %p702_p0 = pnand %p701_p13, %p695_p8 }
  0x63   : > { %v599_v18 = vpop.eup %598 }
  0x64   : > { %v306_v20 = vmul.f32 0.6931472, %v599_v18 }
  0x65   : > { %v601_v21 = vpop.eup %600 }
  0x66   : > { %v276_v22 = vmul.f32 0.6931472, %v601_v21  ;;  %v311_v23 = vmul.f32 %v310_v17, %v306_v20  ;;  %v603_v32 = vpop.eup %602 }
  0x67   : > { %v605_v33 = vpop.eup %604  ;;  %v326_v35 = vmul.f32 0.6931472, %v603_v32 }
  0x68   : > { %v281_v24 = vmul.f32 %v280_v19, %v276_v22  ;;  %v312_v25 = vmul.f32 1.442695, %v311_v23  ;;  %v295_v38 = vmul.f32 0.6931472, %v605_v33 }
  0x6a   : > { %v282_v26 = vmul.f32 1.442695, %v281_v24  ;;  %606 = vpow2.f32 %v312_v25 }
  0x6c   : > { %608 = vpow2.f32 %v282_v26 }
  0x77   : > { %v607_v37 = vpop.eup %606 }
  0x78   : > { %v323_v39 = vsel %vm322_vm8, 0.0, %v607_v37 }
  0x79   : > { %v609_v42 = vpop.eup %608  ;;  %v327_v43 = vmul.f32 %v326_v35, %v323_v39 }
  0x7a   : > { %v293_v44 = vsel %vm292_vm9, 0.0, %v609_v42 }
  0x7b   : > { %v296_v45 = vmul.f32 %v295_v38, %v293_v44 }
  0x7d   : > { %v328_v48 = vsub.f32 %v327_v43, %v296_v45 }
  0x7f   : > { %v329_v49 = vmul.f32 %v328_v48, %v261_v46 }
  0x81   : > { %v330_v50 = vsub.f32 %v329_v49, %v327_v43 }
  0x83   : > { %v342_v51 = vsel %vm341_vm10, %v330_v50, 0.0 }
  0x84   : > { %v344_v52 = vrot.slane %v342_v51, 4 }
  0x86   : > { %v345_v53 = vadd.f32 %v344_v52, %v342_v51 }
  0x88   : > { %v346_v54 = vrot.slane %v345_v53, 2 }
  0x8a   : > { %v347_v55 = vadd.f32 %v346_v54, %v345_v53 }
  0x8c   : > { %v348_v56 = vrot.slane %v347_v55, 1 }
  0x8e   : > { %v349_v58 = vadd.f32 %v348_v56, %v347_v55 }
  0x90   : > { %v350_v59 = vadd.f32 %v349_v58, %v343_v57 }
  0x92   : > { %351 = vst [vmem:[#allocation2] sm:$0x1] %v350_v59 }
  0x99   : > { %v355_v60 = vld [vmem:[#allocation2] sm:$0x1] }
  0x9a   : > { %v357_v61 = vsel %vm356_vm11, %v355_v60, 0.0 }
  0x9b   : > { %358 = vadd.xlane.f32.xlu0 %v357_v61 }
 0x124   : > { %v359_v62 = vpop.xlane.xlu0 %358 }
 0x125   : > { %v360_v63 = vrot.slane %v359_v62, 4 }
 0x127   : > { %v361_v0 = vadd.f32 %v360_v63, %v359_v62 }
 0x129   : > { %v362_v1 = vrot.slane %v361_v0, 2 }
 0x12b   : > { %v363_v2 = vadd.f32 %v362_v1, %v361_v0 }
 0x12d   : > { %v364_v3 = vrot.slane %v363_v2, 1 }
 0x12f   : > { %v365_v4 = vadd.f32 %v364_v3, %v363_v2 }
 0x131   : > { %516 = vpush %v365_v4 }
 0x162   : > { %s517_s6 = spop %516 }
 0x163   : > { %v367_v5 = vstv %s517_s6 }
 0x164   : > { %368 = vst [vmem:[%s252_s20] sm:$0xff] %v367_v5 }
 0x165   : > { %705 = shalt.err (!%p702_p0)
}
 0x166   : > { %s706_s24 = scalar_lea.hbm %s381_s29, 128  ;;  %s710_s22 = scalar_lea.hbm %s1002_s3, 256 }
 0x167   : > { %p707_p5 = scmp.ne.s32.totalorder %s381_s29, %s706_s24  ;;  %p711_p6 = scmp.lt.s32.totalorder %s381_s29, %s1002_s3 }
 0x168   : > { %p712_p9 = scmp.lt.s32.totalorder %s710_s22, %s706_s24 }
 0x169   : > { %p708_p7 = pnand %p707_p5, %p890_p3 }
 0x16a   : > { %p713_p10 = por %p712_p9, %p711_p6 }
 0x16b   : > { %p709_p2 = pneg %p708_p7 }
 0x16d   : > { %p714_p1 = pnand %p713_p10, %p709_p2 }
 0x16f   : > { %717 = shalt.err (!%p714_p1)
}
 0x170   : > { %526 = dma.vmem_to_hbm [thread:$0]  (%p890_p3), %s954_s4, 128, %s381_s29, %s370_s11  }
 0x171 PF: > { %s395_s18 = sand.u32 1, %s760_s12   ;;  %p1012_p4 = scmp.ne.s32.totalorder %s1005_s21, 0 }
 0x172   : > { %p1013_p8 = scmp.ge.s32.totalorder %s780_s17, 2  ;;  %s396_s20 = scalar_lea.sflag [#allocation5], %s395_s18 }
 0x174   : > { %p540_p11 = pnand %p1013_p8, %p1012_p4 }
 0x176   : > { %p541_p12 = pneg %p540_p11 }
 0x178   : > { %755 = dma.done.wait (%p541_p12), %s396_s20, 128  }
 0x179   : > { %757 = vsyncadd (%p541_p12), %s396_s20, 4294967168  ;;  %s22_s17 = sadd.s32 1, %s780_s17   ;;  %s1014_s12 = smov %s764_s13 }
 0x17a   : > { %p19_p13 = scmp.ge.s32.totalorder %s22_s17, 4   ;;  %s1015_s13 = smov %s768_s14 }
 0x17b   : > { %s1016_s14 = smov %s896_s7  ;;  %s1017_s15 = smov %s776_s16 }
 0x17c   : > { %s1018_s16 = smov %s1020_s26  ;;  %21 = sbr.rel (!%p19_p13) target bundleno = 10 (0xa), region = 102 }
 0x181   :  { %401 = vsyncpa [#allocation4], 1 }
 0x182   :  { %403 = vsyncpa [#allocation4 + $0x1], 1 }
 0x183   :  { %404 = vsyncpa [#allocation7], 1 }
 0x184   :  { %406 = vsyncpa [#allocation7 + $0x1], 1 }
 0x185   :  { %407 = vsyncpa [#allocation5], 1 }
 0x186   :  { %409 = vsyncpa [#allocation5 + $0x1], 1 }

</bundles_post_ra>
